<compile_context>
chip_gen: v7x
topology: tpu7x:2x2x1
jax: 0.10.0
libtpu: 0.0.40
codegen_flags: <defaults>
</compile_context>

<pallas_src>
import numpy as np
import jax
import jax.numpy as jnp
from jax.experimental import pallas as pl
from jax.experimental.pallas import tpu as pltpu


def conv_matmul_kernel(w_ref, x_ref, o_ref):
    # w_ref : VMEM (C_out, K)   K = C_in*kH*kW, VMEM-resident across grid steps
    # x_ref : VMEM (K, T)       one lane tile of im2col columns (T % 128 == 0)
    # o_ref : VMEM (C_out, T)   lane-dense output slab
    o_ref[...] = jnp.dot(
        w_ref[...], x_ref[...], preferred_element_type=jnp.float32
    ).astype(o_ref.dtype)


def _round_up(v, m):
    return (v + m - 1) // m * m


def conv2d(x, w, stride=(3, 3), padding=(2, 2)):
    """aten._convolution(..., transposed=False, dilation=1, groups=1, bias=None)."""
    n, c_in, h, w_in = x.shape
    c_out, c_in_w, kh, kw = w.shape
    assert c_in == c_in_w, "groups != 1 not supported"
    sh, sw = stride
    ph, pw = padding
    ho = (h + 2 * ph - kh) // sh + 1
    wo = (w_in + 2 * pw - kw) // sw + 1
    k_dim = c_in * kh * kw
    lane_total = n * ho * wo

    # ---- wrapper-side layout glue (pad + strided tap windows, tiny) -------
    # For stride >= kernel (this module: 3 >= 3) the windows are disjoint, so
    # the im2col tensor has the same footprint as the padded input; with
    # allow_input_fusion below XLA may fuse this whole chain into the kernel's
    # input and avoid materializing it in HBM at all.
    x_pad = jnp.pad(x, ((0, 0), (0, 0), (ph, ph), (pw, pw)))
    cols = []
    for ih in range(kh):
        for iw in range(kw):
            cols.append(
                x_pad[:, :,
                      ih:ih + sh * (ho - 1) + 1:sh,
                      iw:iw + sw * (wo - 1) + 1:sw])      # (N, C_in, Ho, Wo)
    # (kH*kW, N, C_in, Ho, Wo) -> (kH*kW, C_in, N, Ho, Wo) -> (K, N*Ho*Wo)
    # K index = (ih*kW + iw)*C_in + ci ; lane index = n*(Ho*Wo) + h*Wo + w
    x_col = jnp.stack(cols, axis=0).transpose(0, 2, 1, 3, 4)
    x_col = x_col.reshape(k_dim, lane_total)
    # weight -> (C_out, K) with the matching K ordering
    w_col = jnp.transpose(w, (0, 2, 3, 1)).reshape(c_out, k_dim)

    # ---- lane-tile sizing ---------------------------------------------------
    # Multiple of 128 (lane-dense stores), up to 512 lanes, capped so that the
    # double-buffered x tile + output tile stay well inside the smallest
    # (v7x, 64 MiB) VMEM and the default scoped limits on every generation.
    vmem_budget = 8 * 1024 * 1024                      # bytes, conservative
    bytes_per_lane = 4 * 2 * (k_dim + c_out)           # f32, 2x double-buffer
    max_tile = max(128, (vmem_budget // bytes_per_lane) // 128 * 128)
    tile = min(512, _round_up(lane_total, 128), max_tile)
    lane_pad = _round_up(lane_total, tile)
    num_tiles = lane_pad // tile

    x_col = jnp.pad(x_col, ((0, 0), (0, lane_pad - lane_total)))

    cost = pl.CostEstimate(
        flops=2 * c_out * k_dim * lane_pad,
        transcendentals=0,
        bytes_accessed=4 * (c_out * k_dim + k_dim * lane_pad + c_out * lane_pad),
    )

    out_flat = pl.pallas_call(
        conv_matmul_kernel,
        out_shape=jax.ShapeDtypeStruct((c_out, lane_pad), x.dtype),
        grid=(num_tiles,),
        in_specs=[
            pl.BlockSpec((c_out, k_dim), lambda t: (0, 0)),   # weight (resident)
            pl.BlockSpec((k_dim, tile), lambda t: (0, t)),    # im2col lane tile
        ],
        out_specs=pl.BlockSpec((c_out, tile), lambda t: (0, t)),
        compiler_params=pltpu.CompilerParams(
            dimension_semantics=("parallel",),
            allow_input_fusion=[False, True],
        ),
        cost_estimate=cost,
    )(w_col, x_col)

    # Un-flatten: (C_out, N*Ho*Wo) -> (N, C_out, Ho, Wo)  (layout plumbing)
    out = out_flat[:, :lane_total].reshape(c_out, n, ho, wo)
    return jnp.transpose(out, (1, 0, 2, 3))


def _reference_conv(x, w, stride=(3, 3), padding=(2, 2)):
    """Pure-numpy strided cross-correlation (the aten forward-conv definition)."""
    xn = np.asarray(x, np.float64)
    wn = np.asarray(w, np.float64)
    n, c_in, h, w_in = xn.shape
    c_out, _, kh, kw = wn.shape
    sh, sw = stride
    ph, pw = padding
    ho = (h + 2 * ph - kh) // sh + 1
    wo = (w_in + 2 * pw - kw) // sw + 1
    xp = np.zeros((n, c_in, h + 2 * ph, w_in + 2 * pw), np.float64)
    xp[:, :, ph:ph + h, pw:pw + w_in] = xn
    out = np.zeros((n, c_out, ho, wo), np.float64)
    for ih in range(kh):
        for iw in range(kw):
            win = xp[:, :,
                     ih:ih + sh * (ho - 1) + 1:sh,
                     iw:iw + sw * (wo - 1) + 1:sw]          # (N, C_in, Ho, Wo)
            out += np.einsum("nihw,oi->nohw", win, wn[:, :, ih, iw])
    return out


if __name__ == "__main__":
    key = jax.random.PRNGKey(0)
    kx, kw_ = jax.random.split(key)
    # Small shapes consistent with the module's dynamic NCHW contract.
    x = jax.random.normal(kx, (2, 4, 16, 16), dtype=jnp.float32)   # NCHW
    w = jax.random.normal(kw_, (8, 4, 3, 3), dtype=jnp.float32)    # (C_out, C_in, kH, kW)

    out = conv2d(x, w, stride=(3, 3), padding=(2, 2))
    out = jax.block_until_ready(out)

    ref = _reference_conv(x, w, stride=(3, 3), padding=(2, 2))
    np.testing.assert_allclose(np.asarray(out), ref, rtol=1e-4, atol=1e-4)
    print("KERNEL_OK")
</pallas_src>

<mosaic_0001>
module attributes {stable_mosaic.version = 11 : i64} {
  func.func @conv_matmul_kernel(%arg0: i32, %arg1: memref<8x36xf32, #tpu.memory_space<vmem>>, %arg2: memref<36x128xf32, #tpu.memory_space<vmem>>, %arg3: memref<8x128xf32, #tpu.memory_space<vmem>>) attributes {dimension_semantics = [#tpu.dimension_semantics<parallel>], iteration_bounds = array<i64: 1>, scalar_prefetch = 0 : i64, scratch_operands = 0 : i64, tpu.core_type = #tpu.core_type<tc>, window_params = [{pipeline_mode = #tpu.pipeline_mode<synchronous>, transform_indices = @transform_0, window_bounds = array<i64: 8, 36>}, {transform_indices = @transform_1, window_bounds = array<i64: 36, 128>}, {transform_indices = @transform_2, window_bounds = array<i64: 8, 128>}]} {
    %c0 = arith.constant 0 : index
    %c0_0 = arith.constant 0 : index
    %0 = vector.load %arg1[%c0, %c0_0] : memref<8x36xf32, #tpu.memory_space<vmem>>, vector<8x36xf32>
    %c0_1 = arith.constant 0 : index
    %c0_2 = arith.constant 0 : index
    %1 = vector.load %arg2[%c0_1, %c0_2] : memref<36x128xf32, #tpu.memory_space<vmem>>, vector<36x128xf32>
    %cst = arith.constant dense<0.000000e+00> : vector<8x128xf32>
    %2 = tpu.matmul %0, %1, %cst {dimension_numbers = #tpu.dot_dimension_numbers<[1], [0], [0], [1], [0, 0, 1, 1], [], []>} : vector<8x36xf32>, vector<36x128xf32>, vector<8x128xf32> -> vector<8x128xf32>
    %c0_3 = arith.constant 0 : index
    %c0_4 = arith.constant 0 : index
    %3 = vector.load %arg3[%c0_3, %c0_4] : memref<8x128xf32, #tpu.memory_space<vmem>>, vector<8x128xf32>
    tpu.vector_store %arg3[%c0_3, %c0_4], %2 {strides = array<i32>} : memref<8x128xf32, #tpu.memory_space<vmem>>, vector<8x128xf32>,
    return
  }
  func.func @transform_0(%arg0: i32) -> (i32, i32) {
    %c0_i32 = arith.constant 0 : i32
    %c0_i32_0 = arith.constant 0 : i32
    %c0_i32_1 = arith.constant 0 : i32
    return %c0_i32, %c0_i32_0 : i32, i32
  }
  func.func @transform_1(%arg0: i32) -> (i32, i32) {
    %c0_i32 = arith.constant 0 : i32
    %c0_i32_0 = arith.constant 0 : i32
    return %c0_i32, %arg0 : i32, i32
  }
  func.func @transform_2(%arg0: i32) -> (i32, i32) {
    %c0_i32 = arith.constant 0 : i32
    %c0_i32_0 = arith.constant 0 : i32
    return %c0_i32, %arg0 : i32, i32
  }
}

</mosaic_0001>

<bundles_post_ra>
// kernel: tpu_custom_call.1
= control target key start
LH: loop header
LB: loop body
LE: loop exit
PB: predicated region body
PF: predicated region fallthrough
CT: control target
= control target key end

     0   :  { %7 = vsyncpa [#allocation3], 0  ;;  %s312_s0 = inlined_call_operand.hbm [shape: f32[8,36], index: 0, kind: input, shape index: {}]   ;;  %s313_s1 = inlined_call_operand.hbm [shape: f32[36,128], index: 1, kind: input, shape index: {}]   ;;  %s314_s2 = inlined_call_operand.hbm [shape: f32[8,128], index: 2, kind: output, shape index: {}]  }
   0x1   :  { %8 = vsyncpa [#allocation6], 0 }
   0x2   :  { %9 = vsyncpa [#allocation4], 0  ;;  %s246_s9 = smov [#allocation2]   ;;  %s247_s11 = smov [#allocation5]  }
   0x3   :  { %s16_s10 = sshll.u32 %s246_s9, 4  ;;  %s25_s12 = sshll.u32 %s247_s11, 4  ;;  %s17_s10 = int_to_ptr.vmem [resolvable:$true] %s16_s10  ;;  %s269_s12 = int_to_ptr.vmem [resolvable:$true] %s25_s12 }
   0x4   :  { %s174_s15 = scalar_lea.hbm %s312_s0, 128 }
   0x5   :  { %p175_p0 = scmp.ne.s32.totalorder %s312_s0, %s174_s15  ;;  %p178_p1 = scmp.lt.u32.totalorder %s174_s15, %s312_s0 }
   0x7   :  { %p180_p2 = pnand %p178_p1, %p175_p0 }
   0x9   :  { %183 = shalt.err (!%p180_p2)
}
   0xa   :  { %s184_s20 = scalar_lea.vmem %s17_s10, 128  ;;  %p189_p4 = scmp.lt.s32.totalorder %s17_s10, %s17_s10 }
   0xb   :  { %p185_p3 = scmp.ne.s32.totalorder %s17_s10, %s184_s20  ;;  %p190_p5 = scmp.lt.s32.totalorder %s184_s20, %s184_s20 }
   0xd   :  { %p191_p6 = por %p190_p5, %p189_p4 }
   0xf   :  { %p192_p7 = pnand %p191_p6, %p185_p3 }
  0x11   :  { %195 = shalt.err (!%p192_p7)
}
  0x12   :  { %19 = dma.hbm_to_vmem [thread:$0]  %s312_s0, 128, %s17_s10, [#allocation3]  }
  0x13   :  { %s196_s25 = scalar_lea.hbm %s313_s1, 640 }
  0x14   :  { %p197_p8 = scmp.ne.s32.totalorder %s313_s1, %s196_s25  ;;  %p200_p9 = scmp.lt.u32.totalorder %s196_s25, %s313_s1 }
  0x16   :  { %p202_p10 = pnand %p200_p9, %p197_p8 }
  0x18   :  { %205 = shalt.err (!%p202_p10)
}
  0x19   :  { %s206_s30 = scalar_lea.vmem %s269_s12, 640  ;;  %p211_p12 = scmp.lt.s32.totalorder %s269_s12, %s269_s12 }
  0x1a   :  { %p207_p11 = scmp.ne.s32.totalorder %s269_s12, %s206_s30  ;;  %p212_p13 = scmp.lt.s32.totalorder %s206_s30, %s206_s30 }
  0x1c   :  { %p213_p0 = por %p212_p13, %p211_p12 }
  0x1e   :  { %p214_p1 = pnand %p213_p0, %p207_p11 }
  0x20   :  { %217 = shalt.err (!%p214_p1)
}
  0x21   :  { %s248_s0 = smov 128   ;;  %s249_s3 = smov 8  }
  0x22   :  { %31 = dma.hbm_to_vmem [thread:$0]  %s313_s1, 640, %s269_s12, [#allocation6], %s248_s0, %s248_s0, %s249_s3  }
  0x23   :  { %240 = dma.done.wait [#allocation3], 128  }
  0x24   :  { %241 = vsyncadd [#allocation3], 4294967168 }
  0x25   :  { %242 = dma.done.wait [#allocation6], 640  }
  0x26   :  { %243 = vsyncadd [#allocation6], 4294966656  ;;  %v250_v0 = vmov 0.0|0.0   ;;  %vm251_vm0 = vmmov 0   ;;  %v252_v1 = vmov 0.0   ;;  %v39_v2 = vld [vmem:[#allocation5] sm:$0xff] }
  0x27   :  { %160 = vmatprep.subr.bf16.mxu0 %v250_v0  ;;  %157 = vmatprep.mubr.msk.f32.mxu0 %vm251_vm0, %v252_v1  ;;  %v40_v3 = vld [vmem:[#allocation5 + $0x8] sm:$0xff]  ;;  %v41_v4 = vld [vmem:[#allocation5 + $0x10] sm:$0xff]  ;;  %v42_v6 = vld [vmem:[#allocation5 + $0x18] sm:$0xff]  ;;  %vm48_vm1 = vcmask 1043456   ;;  %vm44_vm2 = vcmask 293888   ;;  %s253_s1 = smov [#allocation7]  }
  0x28   :  { %v161_v5 = vpack.c.bf16 %v40_v3, %v39_v2  ;;  %v164_v7 = vpack.c.bf16 %v42_v6, %v41_v4  ;;  %v43_v8 = vld [vmem:[#allocation5 + $0x20] sm:$0xf]  ;;  %v38_v9 = vld [vmem:[#allocation2] sm:$0xff]  ;;  %s129_s6 = sshll.u32 %s253_s1, 4  ;;  %s130_s6 = int_to_ptr.vmem [resolvable:$true] %s129_s6 }
  0x29   :  { %s218_s7 = scalar_lea.vmem %s130_s6, 128  ;;  %p223_p3 = scmp.lt.s32.totalorder %s130_s6, %s130_s6 }
  0x2a   :  { %162 = vmatpush3.bf16.msra.mxu0 %v161_v5  ;;  %p219_p2 = scmp.ne.s32.totalorder %s130_s6, %s218_s7  ;;  %p224_p4 = scmp.lt.s32.totalorder %s218_s7, %s218_s7 }
  0x2b   :  { %163 = vmatprep.subr.bf16.mxu0 %v250_v0 }
  0x2c   :  { %p225_p5 = por %p224_p4, %p223_p3 }
  0x2e   :  { %165 = vmatpush3.bf16.msra.mxu0 %v164_v7  ;;  %p226_p6 = pnand %p225_p5, %p219_p2 }
  0x2f   :  { %155 = vmatprep.subr.mxu0 %v252_v1 }
  0x32   :  { %156 = vmatpush3.msk.msra.mxu0 %vm48_vm1, %v43_v8 }
  0x33   :  { %158 = vmatmul.mubr.msk.f32.vlgmr.msra.gmra.mrb[0].mxu0 %vm44_vm2, %v38_v9 }
 0x106   :  { %v118_v10 = vpop.f32.mrb[0].mxu0 }
 0x107   :  { %122 = vst [vmem:[#allocation7] sm:$0xff] %v118_v10  ;;  %v159_v11 = vpop.f32.mrb[1].mxu0 }
 0x108   :  { %229 = shalt.err (!%p226_p6)
}
 0x109   :  { %s230_s10 = scalar_lea.hbm %s314_s2, 128 }
 0x10a   :  { %p231_p7 = scmp.ne.s32.totalorder %s314_s2, %s230_s10  ;;  %p234_p8 = scmp.lt.u32.totalorder %s230_s10, %s314_s2 }
 0x10c   :  { %p236_p9 = pnand %p234_p8, %p231_p7 }
 0x10e   :  { %239 = shalt.err (!%p236_p9)
}
 0x10f   :  { %132 = dma.vmem_to_hbm [thread:$0]  %s130_s6, 128, %s314_s2, [#allocation4]  }
 0x110   :  { %244 = dma.done.wait [#allocation4], 128  }
 0x111   :  { %245 = vsyncadd [#allocation4], 4294967168 }
 0x112   :  { %136 = vsyncpa [#allocation3], 1 }
 0x113   :  { %137 = vsyncpa [#allocation6], 1 }
 0x114   :  { %138 = vsyncpa [#allocation4], 1 }

</bundles_post_ra>
